<compile_context>
chip_gen: v5e
topology: v5e:2x2
jax: 0.10.0
libtpu: 0.0.40
codegen_flags: <defaults>
</compile_context>

<pallas_src>
import jax
import jax.numpy as jnp
from jax.experimental import pallas as pl
from jax.experimental.pallas import tpu as pltpu


def _round_up(n, m):
    return ((n + m - 1) // m) * m


def mlp_kernel(x_ref, w1_ref, b1_ref, w2_ref, b2_ref, w3_ref, b3_ref, o_ref):
    # x_ref: [8, TB] (features x batch-tile, batch on lanes)
    # wN_ref: [out, in], bN_ref: [out, 1] (broadcasts over lanes)
    x = x_ref[...]  # already f32; no redundant cast

    h1 = jax.nn.sigmoid(
        jnp.dot(w1_ref[...], x, preferred_element_type=jnp.float32) + b1_ref[...]
    )  # [6, TB]
    h2 = jax.nn.sigmoid(
        jnp.dot(w2_ref[...], h1, preferred_element_type=jnp.float32) + b2_ref[...]
    )  # [4, TB]
    y = jax.nn.sigmoid(
        jnp.dot(w3_ref[...], h2, preferred_element_type=jnp.float32) + b3_ref[...]
    )  # [1, TB]

    o_ref[...] = y.astype(o_ref.dtype)


def mlp_forward(x, params, *, max_tile_b=512):
    """x: [B, 8] float32.  params: (w1[6,8], b1[6,1], w2[4,6], b2[4,1], w3[1,4], b3[1,1])."""
    w1, b1, w2, b2, w3, b3 = params
    B, F = x.shape
    assert F == 8, f"expected 8 input features, got {F}"

    # Lane-dense batch tile: multiple of 128, capped so double-buffered tiles stay tiny in VMEM.
    tile_b = min(max_tile_b, _round_up(B, 128))
    b_pad = _round_up(B, tile_b)

    # Layout plumbing in the wrapper: batch -> lane axis, pad to a whole number of tiles.
    x_t = jnp.pad(x.T, ((0, 0), (0, b_pad - B)))  # [8, b_pad]

    grid = (b_pad // tile_b,)

    # Params are tiny (<1 KiB total): full-array blocks with constant index maps stay resident.
    def resident(shape):
        return pl.BlockSpec(shape, lambda i: (0, 0))

    out = pl.pallas_call(
        mlp_kernel,
        out_shape=jax.ShapeDtypeStruct((1, b_pad), x.dtype),
        grid=grid,
        in_specs=[
            pl.BlockSpec((8, tile_b), lambda i: (0, i)),  # x tile, batch on lanes
            resident(w1.shape), resident(b1.shape),
            resident(w2.shape), resident(b2.shape),
            resident(w3.shape), resident(b3.shape),
        ],
        out_specs=pl.BlockSpec((1, tile_b), lambda i: (0, i)),
        compiler_params=pltpu.CompilerParams(
            dimension_semantics=("parallel",),
        ),
    )(x_t, w1, b1, w2, b2, w3, b3)

    # Back to the PyTorch output layout [B, 1].
    return out[:, :B].T


def init_params(key):
    # Mimic torch.nn.Linear init U(-1/sqrt(fan_in), 1/sqrt(fan_in)); store W as [out, in],
    # b as [out, 1] so they broadcast over the lane (batch) axis inside the kernel.
    def linear(key, fan_in, fan_out):
        kw, kb = jax.random.split(key)
        bound = 1.0 / jnp.sqrt(fan_in)
        w = jax.random.uniform(kw, (fan_out, fan_in), jnp.float32, -bound, bound)
        b = jax.random.uniform(kb, (fan_out, 1), jnp.float32, -bound, bound)
        return w, b

    k1, k2, k3 = jax.random.split(key, 3)
    w1, b1 = linear(k1, 8, 6)
    w2, b2 = linear(k2, 6, 4)
    w3, b3 = linear(k3, 4, 1)
    return (w1, b1, w2, b2, w3, b3)


def reference_forward(x, params):
    # Pure-JAX reference in the standard [B, F] layout (PyTorch semantics: x @ W.T + b).
    w1, b1, w2, b2, w3, b3 = params
    h1 = jax.nn.sigmoid(x @ w1.T + b1.T)
    h2 = jax.nn.sigmoid(h1 @ w2.T + b2.T)
    return jax.nn.sigmoid(h2 @ w3.T + b3.T)


if __name__ == "__main__":
    key = jax.random.PRNGKey(0)
    kx, kp, kx2 = jax.random.split(key, 3)

    params = init_params(kp)

    # Small primary check (batch=8, 8 input features), single padded tile.
    B = 8
    x = jax.random.normal(kx, (B, 8), jnp.float32)
    y = mlp_forward(x, params)
    jax.block_until_ready(y)
    y_ref = reference_forward(x, params)
    assert y.shape == (B, 1), y.shape
    assert jnp.allclose(y, y_ref, atol=1e-5, rtol=1e-5), "mismatch vs reference (B=8)"

    # Secondary check that exercises a multi-tile batch grid + padding path.
    B2 = 640
    x2 = jax.random.normal(kx2, (B2, 8), jnp.float32)
    y2 = mlp_forward(x2, params)
    jax.block_until_ready(y2)
    y2_ref = reference_forward(x2, params)
    assert y2.shape == (B2, 1), y2.shape
    assert jnp.allclose(y2, y2_ref, atol=1e-5, rtol=1e-5), "mismatch vs reference (B=640)"

    print("KERNEL_OK")
</pallas_src>

<mosaic_0001>
module attributes {stable_mosaic.version = 11 : i64} {
  func.func @mlp_kernel(%arg0: i32, %arg1: memref<8x128xf32, #tpu.memory_space<vmem>>, %arg2: memref<6x8xf32, #tpu.memory_space<vmem>>, %arg3: memref<6x1xf32, #tpu.memory_space<vmem>>, %arg4: memref<4x6xf32, #tpu.memory_space<vmem>>, %arg5: memref<4x1xf32, #tpu.memory_space<vmem>>, %arg6: memref<1x4xf32, #tpu.memory_space<vmem>>, %arg7: memref<1x1xf32, #tpu.memory_space<vmem>>, %arg8: memref<1x128xf32, #tpu.memory_space<vmem>>) attributes {dimension_semantics = [#tpu.dimension_semantics<parallel>], iteration_bounds = array<i64: 1>, scalar_prefetch = 0 : i64, scratch_operands = 0 : i64, tpu.core_type = #tpu.core_type<tc>, window_params = [{transform_indices = @transform_0, window_bounds = array<i64: 8, 128>}, {pipeline_mode = #tpu.pipeline_mode<synchronous>, transform_indices = @transform_1, window_bounds = array<i64: 6, 8>}, {pipeline_mode = #tpu.pipeline_mode<synchronous>, transform_indices = @transform_2, window_bounds = array<i64: 6, 1>}, {pipeline_mode = #tpu.pipeline_mode<synchronous>, transform_indices = @transform_3, window_bounds = array<i64: 4, 6>}, {pipeline_mode = #tpu.pipeline_mode<synchronous>, transform_indices = @transform_4, window_bounds = array<i64: 4, 1>}, {pipeline_mode = #tpu.pipeline_mode<synchronous>, transform_indices = @transform_5, window_bounds = array<i64: 1, 4>}, {pipeline_mode = #tpu.pipeline_mode<synchronous>, transform_indices = @transform_6, window_bounds = array<i64: 1, 1>}, {transform_indices = @transform_7, window_bounds = array<i64: 1, 128>}]} {
    %c0 = arith.constant 0 : index
    %c0_0 = arith.constant 0 : index
    %0 = vector.load %arg1[%c0, %c0_0] : memref<8x128xf32, #tpu.memory_space<vmem>>, vector<8x128xf32>
    %c0_1 = arith.constant 0 : index
    %c0_2 = arith.constant 0 : index
    %1 = vector.load %arg2[%c0_1, %c0_2] : memref<6x8xf32, #tpu.memory_space<vmem>>, vector<6x8xf32>
    %cst = arith.constant dense<0.000000e+00> : vector<6x128xf32>
    %2 = tpu.matmul %1, %0, %cst {dimension_numbers = #tpu.dot_dimension_numbers<[1], [0], [0], [1], [0, 0, 1, 1], [], []>} : vector<6x8xf32>, vector<8x128xf32>, vector<6x128xf32> -> vector<6x128xf32>
    %c0_3 = arith.constant 0 : index
    %c0_4 = arith.constant 0 : index
    %3 = vector.load %arg3[%c0_3, %c0_4] : memref<6x1xf32, #tpu.memory_space<vmem>>, vector<6x1xf32>
    %4 = vector.broadcast %3 : vector<6x1xf32> to vector<6x128xf32>
    %5 = arith.addf %2, %4 : vector<6x128xf32>
    %6 = arith.negf %5 : vector<6x128xf32>
    %7 = math.exp %6 : vector<6x128xf32>
    %cst_5 = arith.constant 1.000000e+00 : f32
    %8 = vector.broadcast %cst_5 : f32 to vector<6x128xf32>
    %9 = arith.addf %8, %7 : vector<6x128xf32>
    %10 = arith.divf %8, %9 : vector<6x128xf32>
    %c0_6 = arith.constant 0 : index
    %c0_7 = arith.constant 0 : index
    %11 = vector.load %arg4[%c0_6, %c0_7] : memref<4x6xf32, #tpu.memory_space<vmem>>, vector<4x6xf32>
    %cst_8 = arith.constant dense<0.000000e+00> : vector<4x128xf32>
    %12 = tpu.matmul %11, %10, %cst_8 {dimension_numbers = #tpu.dot_dimension_numbers<[1], [0], [0], [1], [0, 0, 1, 1], [], []>} : vector<4x6xf32>, vector<6x128xf32>, vector<4x128xf32> -> vector<4x128xf32>
    %c0_9 = arith.constant 0 : index
    %c0_10 = arith.constant 0 : index
    %13 = vector.load %arg5[%c0_9, %c0_10] : memref<4x1xf32, #tpu.memory_space<vmem>>, vector<4x1xf32>
    %14 = vector.broadcast %13 : vector<4x1xf32> to vector<4x128xf32>
    %15 = arith.addf %12, %14 : vector<4x128xf32>
    %16 = arith.negf %15 : vector<4x128xf32>
    %17 = math.exp %16 : vector<4x128xf32>
    %cst_11 = arith.constant 1.000000e+00 : f32
    %18 = vector.broadcast %cst_11 : f32 to vector<4x128xf32>
    %19 = arith.addf %18, %17 : vector<4x128xf32>
    %20 = arith.divf %18, %19 : vector<4x128xf32>
    %c0_12 = arith.constant 0 : index
    %c0_13 = arith.constant 0 : index
    %21 = vector.load %arg6[%c0_12, %c0_13] : memref<1x4xf32, #tpu.memory_space<vmem>>, vector<1x4xf32>
    %cst_14 = arith.constant dense<0.000000e+00> : vector<1x128xf32>
    %22 = tpu.matmul %21, %20, %cst_14 {dimension_numbers = #tpu.dot_dimension_numbers<[1], [0], [0], [1], [0, 0, 1, 1], [], []>} : vector<1x4xf32>, vector<4x128xf32>, vector<1x128xf32> -> vector<1x128xf32>
    %c0_15 = arith.constant 0 : index
    %c0_16 = arith.constant 0 : index
    %23 = vector.load %arg7[%c0_15, %c0_16] : memref<1x1xf32, #tpu.memory_space<vmem>>, vector<1x1xf32>
    %24 = vector.broadcast %23 : vector<1x1xf32> to vector<1x128xf32>
    %25 = arith.addf %22, %24 : vector<1x128xf32>
    %26 = arith.negf %25 : vector<1x128xf32>
    %27 = math.exp %26 : vector<1x128xf32>
    %cst_17 = arith.constant 1.000000e+00 : f32
    %28 = vector.broadcast %cst_17 : f32 to vector<1x128xf32>
    %29 = arith.addf %28, %27 : vector<1x128xf32>
    %30 = arith.divf %28, %29 : vector<1x128xf32>
    %c0_18 = arith.constant 0 : index
    %c0_19 = arith.constant 0 : index
    %31 = vector.load %arg8[%c0_18, %c0_19] : memref<1x128xf32, #tpu.memory_space<vmem>>, vector<1x128xf32>
    tpu.vector_store %arg8[%c0_18, %c0_19], %30 {strides = array<i32>} : memref<1x128xf32, #tpu.memory_space<vmem>>, vector<1x128xf32>,
    return
  }
  func.func @transform_0(%arg0: i32) -> (i32, i32) {
    %c0_i32 = arith.constant 0 : i32
    %c0_i32_0 = arith.constant 0 : i32
    return %c0_i32, %arg0 : i32, i32
  }
  func.func @transform_1(%arg0: i32) -> (i32, i32) {
    %c0_i32 = arith.constant 0 : i32
    %c0_i32_0 = arith.constant 0 : i32
    %c0_i32_1 = arith.constant 0 : i32
    return %c0_i32, %c0_i32_0 : i32, i32
  }
  func.func @transform_2(%arg0: i32) -> (i32, i32) {
    %c0_i32 = arith.constant 0 : i32
    %c0_i32_0 = arith.constant 0 : i32
    %c0_i32_1 = arith.constant 0 : i32
    return %c0_i32, %c0_i32_0 : i32, i32
  }
  func.func @transform_3(%arg0: i32) -> (i32, i32) {
    %c0_i32 = arith.constant 0 : i32
    %c0_i32_0 = arith.constant 0 : i32
    %c0_i32_1 = arith.constant 0 : i32
    return %c0_i32, %c0_i32_0 : i32, i32
  }
  func.func @transform_4(%arg0: i32) -> (i32, i32) {
    %c0_i32 = arith.constant 0 : i32
    %c0_i32_0 = arith.constant 0 : i32
    %c0_i32_1 = arith.constant 0 : i32
    return %c0_i32, %c0_i32_0 : i32, i32
  }
  func.func @transform_5(%arg0: i32) -> (i32, i32) {
    %c0_i32 = arith.constant 0 : i32
    %c0_i32_0 = arith.constant 0 : i32
    %c0_i32_1 = arith.constant 0 : i32
    return %c0_i32, %c0_i32_0 : i32, i32
  }
  func.func @transform_6(%arg0: i32) -> (i32, i32) {
    %c0_i32 = arith.constant 0 : i32
    %c0_i32_0 = arith.constant 0 : i32
    %c0_i32_1 = arith.constant 0 : i32
    return %c0_i32, %c0_i32_0 : i32, i32
  }
  func.func @transform_7(%arg0: i32) -> (i32, i32) {
    %c0_i32 = arith.constant 0 : i32
    %c0_i32_0 = arith.constant 0 : i32
    return %c0_i32, %arg0 : i32, i32
  }
}

</mosaic_0001>

<bundles_post_ra>
// kernel: tpu_custom_call.1
= control target key start
LH: loop header
LB: loop body
LE: loop exit
PB: predicated region body
PF: predicated region fallthrough
CT: control target
= control target key end

     0   :  { %s365_s0 = inlined_call_operand.vmem [shape: f32[8,128], index: 0, kind: input, shape index: {}]   ;;  %s366_s1 = inlined_call_operand.hbm [shape: f32[6,8], index: 1, kind: input, shape index: {}]   ;;  %s367_s2 = inlined_call_operand.vmem [shape: f32[6,1], index: 2, kind: input, shape index: {}]   ;;  %s368_s3 = inlined_call_operand.vmem [shape: f32[4,6], index: 3, kind: input, shape index: {}]   ;;  %s369_s4 = inlined_call_operand.vmem [shape: f32[4,1], index: 4, kind: input, shape index: {}]   ;;  %s370_s5 = inlined_call_operand.vmem [shape: f32[1,4], index: 5, kind: input, shape index: {}]   ;;  %s371_s6 = inlined_call_operand.<no memory space> [shape: f32[1,1], index: 6, kind: input, shape index: {}]   ;;  %s372_s7 = inlined_call_operand.hbm [shape: f32[1,128], index: 7, kind: output, shape index: {}]  }
   0x1   :  { %v12_v0 = vstv %s371_s6 }
   0x2   :  { %13 = vst [vmem:[#allocation2] sm:$0x1] %v12_v0 }
   0x3   :  { %14 = vsyncpa [#allocation4], 0 }
   0x4   :  { %15 = vsyncpa [#allocation5], 0  ;;  %s23_s28 = sshll.u32 %s366_s1, 4  ;;  %s298_s29 = smov [#allocation3]   ;;  %s24_s28 = int_to_ptr.hbm [resolvable:$true] %s23_s28 }
   0x5   :  { %s25_s30 = sshll.u32 %s298_s29, 4  ;;  %s26_s30 = int_to_ptr.vmem [resolvable:$true] %s25_s30 }
   0x6   :  { %28 = dma.hbm_to_vmem [thread:$0]  %s24_s28, 128, %s26_s30, [#allocation4]  }
   0x7   :  { %294 = dma.done.wait [#allocation4], 128  }
   0x8   :  { %295 = vsyncadd [#allocation4], 4294967168  ;;  %v299_v1 = vmov 0   ;;  %vm51_vm0 = vcmask 64512   ;;  %v43_v2 = vld [vmem:[%s365_s0] sm:$0xff]  ;;  %vm105_vm4 = vcmask 1045504  }
   0x9   :  { %232 = vset.pattern.permute.xlu0 %v299_v1  ;;  %233 = vset.pattern.permute.xlu1 %v299_v1  ;;  %v44_v3 = vld [vmem:[#allocation3] sm:$0x3f]  ;;  %vm101_vm6 = vcmask 48128   ;;  %v149_v25 = vld [vmem:[#allocation2] sm:$0x1]  ;;  %vm160_vm10 = vcmask 1043456  }
   0xa   :  { %v45_v4 = vld [vmem:[%s367_s2] sm:$0x3f]  ;;  %70 = vmatpush.msra.mxu0 %v43_v2  ;;  %152 = vperm.xlu1 %233, %v149_v25   ;;  %vm156_vm12 = vcmask 31744   ;;  %s211_s15 = sshll.u32 %s372_s7, 4  ;;  %s212_s15 = int_to_ptr.hbm [resolvable:$true] %s211_s15 }
   0xb   :  { %48 = vperm.xlu0 %232, %v45_v4   ;;  %221 = vmatmul.msk.f32.vlgmr.msra.gmra.mxu0 %vm51_vm0, %v44_v3  ;;  %v95_v5 = vld [vmem:[%s369_s4] sm:$0xf] }
   0xc   :  { %v94_v21 = vld [vmem:[%s368_s3] sm:$0xf] }
   0xd   :  { %v148_v39 = vld [vmem:[%s370_s5] sm:$0x1]  ;;  %s300_s5 = smov [#allocation6]  }
   0xe   :  { %s209_s12 = sshll.u32 %s300_s5, 4  ;;  %s210_s12 = int_to_ptr.vmem [resolvable:$true] %s209_s12 }
  0x13   :  { %98 = vperm.xlu0 %232, %v95_v5  }
  0x7c   :  { %v153_v41 = vpop.permute.xlu1 %152 }
  0x7d   :  { %v49_v6 = vpop.permute.xlu0 %48  ;;  %v155_v42 = vperm.slane %v153_v41, 0 }
  0x85   :  { %v99_v23 = vpop.permute.xlu0 %98 }
  0x88   :  { %v72_v7 = vpop.f32.mrf.mxu0 }
  0x89   :  { %v73_v8 = vadd.f32 %v72_v7, %v49_v6 }
  0x8b   :  { %v222_v9 = vmul.f32 -1.442695, %v73_v8 }
  0x8d   :  { %234 = vpow2.f32 %v222_v9 }
  0x93   :  { %v235_v10 = vpop.eup %234 }
  0x94   :  { %v78_v11 = vadd.f32 1.0, %v235_v10 }
  0x96   :  { %236 = vrcp.f32 %v78_v11  ;;  %v90_v15 = vand.u32 2147483648, %v78_v11  ;;  %v88_v17 = vand.u32 2147483647, %v78_v11  ;;  %vm84_vm2 = vweird.f32 %v78_v11 }
  0x98   :  { %v91_v19 = vor.u32 1.1754944e-38, %v90_v15  ;;  %vm89_vm5 = vcmp.eq.f32.partialorder %v88_v17, 8.507059e+37 }
  0x9c   :  { %v237_v12 = vpop.eup %236 }
  0x9d   :  { %v80_v13 = vmul.f32 %v237_v12, %v78_v11  ;;  %vm85_vm1 = vweird.f32 %v237_v12 }
  0x9e   :  { %vm86_vm3 = vmor %vm84_vm2, %vm85_vm1 }
  0x9f   :  { %v81_v14 = vsub.f32 1.0, %v80_v13 }
  0xa1   :  { %v82_v16 = vmul.f32 %v237_v12, %v81_v14 }
  0xa3   :  { %v83_v18 = vadd.f32 %v237_v12, %v82_v16 }
  0xa5   :  { %v87_v20 = vsel %vm86_vm3, %v237_v12, %v83_v18 }
  0xa6   :  { %v92_v22 = vsel %vm89_vm5, %v91_v19, %v87_v20 }
  0xa7   :  { %223 = vmatpush.msk.msra.mxu1 %vm105_vm4, %v92_v22 }
  0xa8   :  { %224 = vmatmul.msk.f32.vlgmr.msra.gmra.mxu1 %vm101_vm6, %v94_v21 }
 0x125   :  { %v126_v24 = vpop.f32.mrf.mxu1 }
 0x126   :  { %v127_v26 = vadd.f32 %v126_v24, %v99_v23 }
 0x128   :  { %v225_v27 = vmul.f32 -1.442695, %v127_v26 }
 0x12a   :  { %238 = vpow2.f32 %v225_v27 }
 0x130   :  { %v239_v28 = vpop.eup %238 }
 0x131   :  { %v132_v29 = vadd.f32 1.0, %v239_v28 }
 0x133   :  { %240 = vrcp.f32 %v132_v29  ;;  %v144_v33 = vand.u32 2147483648, %v132_v29  ;;  %v142_v35 = vand.u32 2147483647, %v132_v29  ;;  %vm138_vm8 = vweird.f32 %v132_v29 }
 0x135   :  { %v145_v37 = vor.u32 1.1754944e-38, %v144_v33  ;;  %vm143_vm11 = vcmp.eq.f32.partialorder %v142_v35, 8.507059e+37 }
 0x139   :  { %v241_v30 = vpop.eup %240 }
 0x13a   :  { %v134_v31 = vmul.f32 %v241_v30, %v132_v29  ;;  %vm139_vm7 = vweird.f32 %v241_v30 }
 0x13b   :  { %vm140_vm9 = vmor %vm138_vm8, %vm139_vm7 }
 0x13c   :  { %v135_v32 = vsub.f32 1.0, %v134_v31 }
 0x13e   :  { %v136_v34 = vmul.f32 %v241_v30, %v135_v32 }
 0x140   :  { %v137_v36 = vadd.f32 %v241_v30, %v136_v34 }
 0x142   :  { %v141_v38 = vsel %vm140_vm9, %v241_v30, %v137_v36 }
 0x143   :  { %v146_v40 = vsel %vm143_vm11, %v145_v37, %v141_v38 }
 0x144   :  { %226 = vmatpush.msk.msra.mxu2 %vm160_vm10, %v146_v40 }
 0x145   :  { %227 = vmatmul.msk.f32.vlgmr.msra.gmra.mxu2 %vm156_vm12, %v148_v39 }
 0x1c8   :  { %v181_v43 = vpop.f32.mrf.mxu2 }
 0x1c9   :  { %v182_v44 = vadd.f32 %v181_v43, %v155_v42 }
 0x1cb   :  { %v228_v45 = vmul.f32 -1.442695, %v182_v44 }
 0x1cd   :  { %242 = vpow2.f32 %v228_v45 }
 0x1d3   :  { %v243_v46 = vpop.eup %242 }
 0x1d4   :  { %v187_v47 = vadd.f32 1.0, %v243_v46 }
 0x1d6   :  { %244 = vrcp.f32 %v187_v47  ;;  %v199_v51 = vand.u32 2147483648, %v187_v47  ;;  %v197_v53 = vand.u32 2147483647, %v187_v47  ;;  %vm193_vm14 = vweird.f32 %v187_v47 }
 0x1d8   :  { %v200_v55 = vor.u32 1.1754944e-38, %v199_v51  ;;  %vm198_vm0 = vcmp.eq.f32.partialorder %v197_v53, 8.507059e+37 }
 0x1dc   :  { %v245_v48 = vpop.eup %244 }
 0x1dd   :  { %v189_v49 = vmul.f32 %v245_v48, %v187_v47  ;;  %vm194_vm13 = vweird.f32 %v245_v48 }
 0x1de   :  { %vm195_vm15 = vmor %vm193_vm14, %vm194_vm13 }
 0x1df   :  { %v190_v50 = vsub.f32 1.0, %v189_v49 }
 0x1e1   :  { %v191_v52 = vmul.f32 %v245_v48, %v190_v50 }
 0x1e3   :  { %v192_v54 = vadd.f32 %v245_v48, %v191_v52 }
 0x1e5   :  { %v196_v56 = vsel %vm195_vm15, %v245_v48, %v192_v54 }
 0x1e6   :  { %v201_v57 = vsel %vm198_vm0, %v200_v55, %v196_v56 }
 0x1e7   :  { %203 = vst [vmem:[#allocation6] sm:$0x1] %v201_v57 }
 0x1e8   :  { %214 = dma.vmem_to_hbm [thread:$0]  %s210_s12, 16, %s212_s15, [#allocation5]  }
 0x1e9   :  { %296 = dma.done.wait [#allocation5], 16  }
 0x1ea   :  { %297 = vsyncadd [#allocation5], 4294967280 }
 0x1eb   :  { %219 = vsyncpa [#allocation4], 1 }
 0x1ec   :  { %220 = vsyncpa [#allocation5], 1 }

</bundles_post_ra>
